<compile_context>
chip_gen: v5e
topology: v5e:2x2
jax: 0.10.0
libtpu: 0.0.40
codegen_flags: <defaults>
</compile_context>

<pallas_src>
from functools import partial

import jax
import jax.numpy as jnp
from jax import lax
from jax.experimental import pallas as pl
from jax.experimental.pallas import tpu as pltpu

EPS = 1e-5  # InstanceNorm2d default eps


def _round_up(x, m):
    return (x + m - 1) // m * m


def _physical_vmem_bytes():
    """Per-TensorCore physical VMEM (64 MiB on v7x, 128 MiB on v5e/v6e)."""
    try:
        info = pltpu.get_tpu_info()
        for attr in ("vmem_capacity_bytes", "vmem_bytes", "vmem_size_bytes"):
            v = getattr(info, attr, None)
            if v:
                return int(v)
    except Exception:
        pass
    return 64 << 20  # conservative (v7x-sized) default


def _downconv_kernel(x_ref, w_ref, b_ref, o_ref, s_ref, *,
                     leaky, e_valid, e_pad, e_tile):
    # x_ref: (1, K, tE)  bf16 GeMM features (K on sublanes, E on lanes)
    # w_ref: (tCout, K)  bf16,  b_ref: (tCout, 1) f32
    # o_ref: (1, tCout, E_pad) out_dtype -- resident across the E-tile axis
    # s_ref: (tCout, 1)  f32 running sum for the instance-norm mean
    ei = pl.program_id(2)
    n_e = pl.num_programs(2)
    needs_mask = e_pad > e_valid  # static: only true when E was padded

    @pl.when(ei == 0)
    def _init():
        s_ref[...] = jnp.zeros_like(s_ref)

    # Conv2d(Cin, Cout, (1,5)) == contraction over K = Cin*5.
    # (tCout, K) @ (K, tE) -> (tCout, tE): canonical MXU operands, E lane-dense.
    y = jnp.dot(w_ref[...], x_ref[0], preferred_element_type=jnp.float32)
    y = y + b_ref[...]                              # (tCout, tE) + (tCout, 1)
    y = jnp.where(y >= 0, y, leaky * y)             # leaky ReLU in f32

    start = pl.multiple_of(ei * e_tile, e_tile)

    # Per-(batch, channel) running sum (mean); variance is two-pass (finalize).
    if needs_mask:
        lane = lax.broadcasted_iota(jnp.int32, (1, e_tile), 1) + start
        y_sum = jnp.where(lane < e_valid, y, 0.0)
    else:
        y_sum = y
    s_ref[...] += jnp.sum(y_sum, axis=1, keepdims=True)

    # Stash un-normalized activations into the resident (tCout, E_pad) block.
    o_ref[0, :, pl.ds(start, e_tile)] = y.astype(o_ref.dtype)

    @pl.when(ei == n_e - 1)
    def _finalize():
        inv_n = 1.0 / float(e_valid)
        mean = s_ref[...] * inv_n                   # (tCout, 1)
        o = o_ref[0].astype(jnp.float32)            # (tCout, E_pad)
        diff = o - mean
        if needs_mask:
            lane = lax.broadcasted_iota(jnp.int32, (1, e_pad), 1)
            diff = jnp.where(lane < e_valid, diff, 0.0)
        var = jnp.sum(diff * diff, axis=1, keepdims=True) * inv_n  # biased var
        inv_std = lax.rsqrt(var + EPS)
        o_ref[0] = (diff * inv_std).astype(o_ref.dtype)


def _build_gemm_features(fe, gemm):
    """MeshConv.create_GeMM glue, emitted directly in (B, K, E) bf16 order
    (K = Cin*5 with index c*5+k, matching weight.reshape(Cout, Cin*5))."""
    B, C, E = fe.shape
    fe_b = fe.astype(jnp.bfloat16)
    pad = jnp.zeros((B, C, 1), jnp.bfloat16)
    xp = jnp.concatenate([pad, fe_b], axis=2)              # (B, C, E+1); col 0 = pad
    gi = (gemm + 1).astype(jnp.int32)                      # shift: -1 (pad) -> 0
    nbr = jax.vmap(lambda xb, gb: xb[:, gb])(xp, gi)       # (B, C, E, 4)
    n1, n2, n3, n4 = nbr[..., 0], nbr[..., 1], nbr[..., 2], nbr[..., 3]
    f = jnp.stack(
        [fe_b, n1 + n3, n2 + n4, jnp.abs(n1 - n3), jnp.abs(n2 - n4)], axis=2
    )                                                      # (B, C, 5, E)
    return f.reshape(B, C * 5, E)


def down_conv_forward(fe, gemm, weight, bias, *, leaky=0.0, e_tile=None,
                      cout_tile=None, out_dtype=jnp.bfloat16):
    """DownConv(in_c, out_c, blocks=0, pool=0, leaky=leaky).forward((fe, meshes)).

    fe:     (B, C_in, E) float edge features
    gemm:   (B, E, 4)    int32 one-ring neighbor edge indices (-1 == padding)
    weight: (C_out, C_in, 1, 5) MeshConv Conv2d weight
    bias:   (C_out,)
    returns (x2, before_pool) with x2: (B, C_out, E) and before_pool = None.
    """
    B, Cin, E = fe.shape
    Cout = weight.shape[0]
    K = Cin * 5

    # ---- tiling ------------------------------------------------------------
    if e_tile is None:
        e_tile = 1024
    e_tile = max(128, (int(e_tile) // 128) * 128)
    e_tile = min(e_tile, _round_up(E, 128))
    e_pad = _round_up(E, e_tile)
    n_e = e_pad // e_tile

    if cout_tile is None:
        tc = Cout
    else:
        tc = max(16, (int(cout_tile) // 16) * 16)
        if tc >= Cout or Cout % tc != 0:
            tc = Cout
    n_c = Cout // tc

    # ---- operands (bf16 MXU inputs, f32 bias) --------------------------------
    x = _build_gemm_features(fe, gemm)                     # (B, K, E) bf16
    if e_pad != E:
        x = jnp.pad(x, ((0, 0), (0, 0), (0, e_pad - E)))   # zero pad columns
    w = weight.reshape(Cout, K).astype(jnp.bfloat16)
    b = bias.reshape(Cout, 1).astype(jnp.float32)

    # ---- VMEM budget (per-generation cap via get_tpu_info) -------------------
    out_itemsize = jnp.dtype(out_dtype).itemsize
    need = (2 * _round_up(K, 16) * e_tile * 2              # double-buffered x tile
            + 2 * _round_up(tc, 16) * _round_up(K, 128) * 2    # weight
            + 2 * _round_up(tc, 8) * 128 * 4                   # bias
            + 2 * _round_up(tc, 16) * e_pad * out_itemsize     # resident out block
            + 2 * _round_up(tc, 8) * e_pad * 4                 # finalize f32 temps
            + _round_up(tc, 8) * 128 * 4)                      # sum scratch
    cap = _physical_vmem_bytes() - (8 << 20)
    vmem_limit = int(min(max(32 << 20, (need * 3) // 2 + (4 << 20)), cap))

    cost = pl.CostEstimate(
        flops=2 * B * Cout * K * e_pad,
        transcendentals=B * Cout,
        bytes_accessed=(n_c * x.size * 2 + w.size * 2 + b.size * 4
                        + 2 * B * Cout * e_pad * out_itemsize))

    kernel = partial(_downconv_kernel, leaky=float(leaky),
                     e_valid=int(E), e_pad=int(e_pad), e_tile=int(e_tile))

    out = pl.pallas_call(
        kernel,
        out_shape=jax.ShapeDtypeStruct((B, Cout, e_pad), out_dtype),
        grid=(B, n_c, n_e),
        in_specs=[
            pl.BlockSpec((1, K, e_tile), lambda bi, ci, ei: (bi, 0, ei)),
            pl.BlockSpec((tc, K), lambda bi, ci, ei: (ci, 0)),
            pl.BlockSpec((tc, 1), lambda bi, ci, ei: (ci, 0)),
        ],
        out_specs=pl.BlockSpec((1, tc, e_pad), lambda bi, ci, ei: (bi, ci, 0)),
        scratch_shapes=[pltpu.VMEM((tc, 1), jnp.float32)],
        compiler_params=pltpu.CompilerParams(
            dimension_semantics=("parallel", "parallel", "arbitrary"),
            vmem_limit_bytes=vmem_limit),
        cost_estimate=cost,
    )(x, w, b)

    if e_pad != E:
        out = out[:, :, :E]
    before_pool = None
    return out, before_pool


def _reference_forward(fe, gemm, weight, bias, *, leaky=0.0):
    """Pure-JAX f32 reference of the same forward (sanity check)."""
    B, C, E = fe.shape
    Cout = weight.shape[0]
    pad = jnp.zeros((B, C, 1), fe.dtype)
    xp = jnp.concatenate([pad, fe], axis=2)
    gi = (gemm + 1).astype(jnp.int32)
    nbr = jax.vmap(lambda xb, gb: xb[:, gb])(xp, gi)       # (B, C, E, 4)
    n1, n2, n3, n4 = nbr[..., 0], nbr[..., 1], nbr[..., 2], nbr[..., 3]
    f = jnp.stack(
        [fe, n1 + n3, n2 + n4, jnp.abs(n1 - n3), jnp.abs(n2 - n4)], axis=2)
    x = f.reshape(B, C * 5, E)
    w = weight.reshape(Cout, C * 5)
    y = jnp.einsum("ok,bke->boe", w, x) + bias[None, :, None]
    y = jnp.where(y >= 0, y, leaky * y)
    mean = jnp.mean(y, axis=2, keepdims=True)
    var = jnp.mean((y - mean) ** 2, axis=2, keepdims=True)
    return (y - mean) * lax.rsqrt(var + EPS)


if __name__ == "__main__":
    def make_inputs(key, B, Cin, Cout, E):
        k_fe, k_gemm, k_w, k_b = jax.random.split(key, 4)
        fe = jax.random.normal(k_fe, (B, Cin, E), dtype=jnp.float32)
        # -1 == "no neighbor" (maps to the zero pad row), as in MeshCNN.
        gemm = jax.random.randint(k_gemm, (B, E, 4), -1, E, dtype=jnp.int32)
        weight = 0.1 * jax.random.normal(k_w, (Cout, Cin, 1, 5), dtype=jnp.float32)
        bias = 0.1 * jax.random.normal(k_b, (Cout,), dtype=jnp.float32)
        return fe, gemm, weight, bias

    k1, k2 = jax.random.split(jax.random.PRNGKey(0))

    # Case 1: aligned E, multi-E-tile accumulate/finalize path.
    fe, gemm, w, b = make_inputs(k1, B=2, Cin=4, Cout=16, E=256)
    fwd1 = jax.jit(lambda fe, g, w, b: down_conv_forward(
        fe, g, w, b, leaky=0.0, e_tile=128))
    x2, bp = fwd1(fe, gemm, w, b)
    jax.block_until_ready(x2)
    ref = _reference_forward(fe, gemm, w, b, leaky=0.0)
    assert x2.shape == (2, 16, 256) and bp is None
    assert bool(jnp.all(jnp.isfinite(x2)))
    err1 = float(jnp.max(jnp.abs(x2.astype(jnp.float32) - ref)))
    assert err1 < 0.15, err1                      # bf16 operands vs f32 reference

    # Case 2: B=1, ragged E (pad + mask), Cout-split grid axis, leaky > 0.
    fe, gemm, w, b = make_inputs(k2, B=1, Cin=3, Cout=32, E=200)
    fwd2 = jax.jit(lambda fe, g, w, b: down_conv_forward(
        fe, g, w, b, leaky=0.2, e_tile=128, cout_tile=16))
    x2, bp = fwd2(fe, gemm, w, b)
    jax.block_until_ready(x2)
    ref = _reference_forward(fe, gemm, w, b, leaky=0.2)
    assert x2.shape == (1, 32, 200) and bp is None
    assert bool(jnp.all(jnp.isfinite(x2)))
    err2 = float(jnp.max(jnp.abs(x2.astype(jnp.float32) - ref)))
    assert err2 < 0.15, err2

    print("KERNEL_OK")
</pallas_src>

<mosaic_0001>
module attributes {stable_mosaic.version = 11 : i64} {
  func.func @_downconv_kernel(%arg0: i32, %arg1: i32, %arg2: i32, %arg3: memref<1x20x128xbf16, #tpu.memory_space<vmem>>, %arg4: memref<16x20xbf16, #tpu.memory_space<vmem>>, %arg5: memref<16x1xf32, #tpu.memory_space<vmem>>, %arg6: memref<1x16x256xbf16, #tpu.memory_space<vmem>>, %arg7: memref<16x1xf32, #tpu.memory_space<vmem>>) attributes {dimension_semantics = [#tpu.dimension_semantics<parallel>, #tpu.dimension_semantics<parallel>, #tpu.dimension_semantics<arbitrary>], iteration_bounds = array<i64: 2, 1, 2>, scalar_prefetch = 0 : i64, scratch_operands = 1 : i64, tpu.core_type = #tpu.core_type<tc>, window_params = [{transform_indices = @transform_0, window_bounds = array<i64: 1, 20, 128>}, {transform_indices = @transform_1, window_bounds = array<i64: 16, 20>}, {transform_indices = @transform_2, window_bounds = array<i64: 16, 1>}, {transform_indices = @transform_3, window_bounds = array<i64: 1, 16, 256>}]} {
    %c0_i32 = arith.constant 0 : i32
    %0 = arith.cmpi eq, %arg2, %c0_i32 : i32
    %1 = arith.extui %0 : i1 to i32
    %c0_i32_0 = arith.constant 0 : i32
    %2 = arith.cmpi ne, %1, %c0_i32_0 : i32
    scf.if %2 {
      %cst_17 = arith.constant 0.000000e+00 : f32
      %30 = vector.broadcast %cst_17 : f32 to vector<16x1xf32>
      %c0_18 = arith.constant 0 : index
      %c0_19 = arith.constant 0 : index
      %31 = vector.load %arg7[%c0_18, %c0_19] : memref<16x1xf32, #tpu.memory_space<vmem>>, vector<16x1xf32>
      tpu.vector_store %arg7[%c0_18, %c0_19], %30 {strides = array<i32>} : memref<16x1xf32, #tpu.memory_space<vmem>>, vector<16x1xf32>,
    } else {
    }
    %c0 = arith.constant 0 : index
    %c0_1 = arith.constant 0 : index
    %3 = vector.load %arg4[%c0, %c0_1] : memref<16x20xbf16, #tpu.memory_space<vmem>>, vector<16x20xbf16>
    %c0_2 = arith.constant 0 : index
    %c0_3 = arith.constant 0 : index
    %c0_4 = arith.constant 0 : index
    %4 = vector.load %arg3[%c0_2, %c0_3, %c0_4] : memref<1x20x128xbf16, #tpu.memory_space<vmem>>, vector<1x20x128xbf16>
    %5 = vector.shape_cast %4 : vector<1x20x128xbf16> to vector<20x128xbf16>
    %cst = arith.constant dense<0.000000e+00> : vector<16x128xf32>
    %6 = tpu.matmul %3, %5, %cst {dimension_numbers = #tpu.dot_dimension_numbers<[1], [0], [0], [1], [0, 0, 1, 1], [], []>} : vector<16x20xbf16>, vector<20x128xbf16>, vector<16x128xf32> -> vector<16x128xf32>
    %c0_5 = arith.constant 0 : index
    %c0_6 = arith.constant 0 : index
    %7 = vector.load %arg5[%c0_5, %c0_6] : memref<16x1xf32, #tpu.memory_space<vmem>>, vector<16x1xf32>
    %8 = vector.broadcast %7 : vector<16x1xf32> to vector<16x128xf32>
    %9 = arith.addf %6, %8 : vector<16x128xf32>
    %cst_7 = arith.constant 0.000000e+00 : f32
    %10 = vector.broadcast %cst_7 : f32 to vector<16x128xf32>
    %11 = arith.cmpf oge, %9, %10 : vector<16x128xf32>
    %cst_8 = arith.constant 0.000000e+00 : f32
    %12 = vector.broadcast %cst_8 : f32 to vector<16x128xf32>
    %13 = arith.mulf %12, %9 : vector<16x128xf32>
    %14 = arith.select %11, %9, %13 : vector<16x128xi1>, vector<16x128xf32>
    %c128_i32 = arith.constant 128 : i32
    %15 = arith.muli %arg2, %c128_i32 : i32
    %16 = tpu.assume_multiple %15, 128 : i32
    %c0_9 = arith.constant 0 : index
    %c0_10 = arith.constant 0 : index
    %17 = vector.load %arg7[%c0_9, %c0_10] : memref<16x1xf32, #tpu.memory_space<vmem>>, vector<16x1xf32>
    %cst_11 = arith.constant dense<0.000000e+00> : vector<16xf32>
    %18 = vector.multi_reduction <add>, %14, %cst_11 [1] : vector<16x128xf32> to vector<16xf32>
    %19 = vector.shape_cast %18 : vector<16xf32> to vector<16x1xf32>
    %20 = arith.addf %17, %19 : vector<16x1xf32>
    %c0_12 = arith.constant 0 : index
    %c0_13 = arith.constant 0 : index
    %21 = vector.load %arg7[%c0_12, %c0_13] : memref<16x1xf32, #tpu.memory_space<vmem>>, vector<16x1xf32>
    tpu.vector_store %arg7[%c0_12, %c0_13], %20 {strides = array<i32>} : memref<16x1xf32, #tpu.memory_space<vmem>>, vector<16x1xf32>,
    %22 = arith.truncf %14 : vector<16x128xf32> to vector<16x128xbf16>
    %c0_14 = arith.constant 0 : index
    %c0_15 = arith.constant 0 : index
    %23 = arith.index_cast %16 : i32 to index
    %24 = vector.load %arg6[%c0_14, %c0_15, %23] : memref<1x16x256xbf16, #tpu.memory_space<vmem>>, vector<1x16x128xbf16>
    %25 = vector.shape_cast %24 : vector<1x16x128xbf16> to vector<16x128xbf16>
    %26 = vector.shape_cast %22 : vector<16x128xbf16> to vector<1x16x128xbf16>
    tpu.vector_store %arg6[%c0_14, %c0_15, %23], %26 {strides = array<i32>} : memref<1x16x256xbf16, #tpu.memory_space<vmem>>, vector<1x16x128xbf16>,
    %c1_i32 = arith.constant 1 : i32
    %27 = arith.cmpi eq, %arg2, %c1_i32 : i32
    %28 = arith.extui %27 : i1 to i32
    %c0_i32_16 = arith.constant 0 : i32
    %29 = arith.cmpi ne, %28, %c0_i32_16 : i32
    scf.if %29 {
      %c0_17 = arith.constant 0 : index
      %c0_18 = arith.constant 0 : index
      %30 = vector.load %arg7[%c0_17, %c0_18] : memref<16x1xf32, #tpu.memory_space<vmem>>, vector<16x1xf32>
      %cst_19 = arith.constant 3.906250e-03 : f32
      %31 = vector.broadcast %cst_19 : f32 to vector<16x1xf32>
      %32 = arith.mulf %30, %31 : vector<16x1xf32>
      %c0_20 = arith.constant 0 : index
      %c0_21 = arith.constant 0 : index
      %c0_22 = arith.constant 0 : index
      %33 = vector.load %arg6[%c0_20, %c0_21, %c0_22] : memref<1x16x256xbf16, #tpu.memory_space<vmem>>, vector<1x16x256xbf16>
      %34 = vector.shape_cast %33 : vector<1x16x256xbf16> to vector<16x256xbf16>
      %35 = arith.extf %34 : vector<16x256xbf16> to vector<16x256xf32>
      %36 = vector.broadcast %32 : vector<16x1xf32> to vector<16x256xf32>
      %37 = arith.subf %35, %36 : vector<16x256xf32>
      %38 = arith.mulf %37, %37 : vector<16x256xf32>
      %cst_23 = arith.constant dense<0.000000e+00> : vector<16xf32>
      %39 = vector.multi_reduction <add>, %38, %cst_23 [1] : vector<16x256xf32> to vector<16xf32>
      %40 = vector.shape_cast %39 : vector<16xf32> to vector<16x1xf32>
      %cst_24 = arith.constant 3.906250e-03 : f32
      %41 = vector.broadcast %cst_24 : f32 to vector<16x1xf32>
      %42 = arith.mulf %40, %41 : vector<16x1xf32>
      %cst_25 = arith.constant 9.99999974E-6 : f32
      %43 = vector.broadcast %cst_25 : f32 to vector<16x1xf32>
      %44 = arith.addf %42, %43 : vector<16x1xf32>
      %45 = math.rsqrt %44 : vector<16x1xf32>
      %46 = vector.broadcast %45 : vector<16x1xf32> to vector<16x256xf32>
      %47 = arith.mulf %37, %46 : vector<16x256xf32>
      %48 = arith.truncf %47 : vector<16x256xf32> to vector<16x256xbf16>
      %c0_26 = arith.constant 0 : index
      %c0_27 = arith.constant 0 : index
      %c0_28 = arith.constant 0 : index
      %49 = vector.load %arg6[%c0_26, %c0_27, %c0_28] : memref<1x16x256xbf16, #tpu.memory_space<vmem>>, vector<1x16x256xbf16>
      %50 = vector.shape_cast %49 : vector<1x16x256xbf16> to vector<16x256xbf16>
      %51 = vector.shape_cast %48 : vector<16x256xbf16> to vector<1x16x256xbf16>
      tpu.vector_store %arg6[%c0_26, %c0_27, %c0_28], %51 {strides = array<i32>} : memref<1x16x256xbf16, #tpu.memory_space<vmem>>, vector<1x16x256xbf16>,
    } else {
    }
    return
  }
  func.func @transform_0(%arg0: i32, %arg1: i32, %arg2: i32) -> (i32, i32, i32) {
    %c0_i32 = arith.constant 0 : i32
    %c0_i32_0 = arith.constant 0 : i32
    return %arg0, %c0_i32, %arg2 : i32, i32, i32
  }
  func.func @transform_1(%arg0: i32, %arg1: i32, %arg2: i32) -> (i32, i32) {
    %c0_i32 = arith.constant 0 : i32
    %c0_i32_0 = arith.constant 0 : i32
    return %arg1, %c0_i32 : i32, i32
  }
  func.func @transform_2(%arg0: i32, %arg1: i32, %arg2: i32) -> (i32, i32) {
    %c0_i32 = arith.constant 0 : i32
    %c0_i32_0 = arith.constant 0 : i32
    return %arg1, %c0_i32 : i32, i32
  }
  func.func @transform_3(%arg0: i32, %arg1: i32, %arg2: i32) -> (i32, i32, i32) {
    %c0_i32 = arith.constant 0 : i32
    %c0_i32_0 = arith.constant 0 : i32
    return %arg0, %arg1, %c0_i32 : i32, i32, i32
  }
}

</mosaic_0001>

<bundles_post_ra>
// kernel: _lambda_.1
= control target key start
LH: loop header
LB: loop body
LE: loop exit
PB: predicated region body
PF: predicated region fallthrough
CT: control target
= control target key end

     0   :  { %s1028_s0 = inlined_call_operand.vmem [shape: bf16[2,20,256], index: 0, kind: input, shape index: {}]   ;;  %s1029_s1 = inlined_call_operand.vmem [shape: bf16[16,20], index: 1, kind: input, shape index: {}]   ;;  %s1030_s2 = inlined_call_operand.vmem [shape: f32[16,1], index: 2, kind: input, shape index: {}]   ;;  %s1031_s3 = inlined_call_operand.hbm [shape: bf16[2,16,256], index: 3, kind: output, shape index: {}]  }
   0x1   :  { %1032 = sst [smem:[#allocation7_spill]] %s1028_s0 }
   0x2   :  { %8 = vsyncpa [#allocation5], 0 }
   0x3   :  { %10 = vsyncpa [#allocation5 + $0x1], 0  ;;  %s853_s12 = smov 0   ;;  %s855_s13 = smov 0  }
   0x4   :  { %s857_s14 = smov 0   ;;  %s859_s15 = smov 0  }
   0x5   :  { %s861_s16 = smov 0   ;;  %s863_s17 = smov 0  }
   0x6   :  { %s865_s18 = smov 0   ;;  %s867_s19 = smov 0  }
   0x7   :  { %s869_s20 = smov 0   ;;  %s871_s21 = smov 0  }
   0x8 LB: > { %s585_s22 = sadd.s32 4294967295, %s826_s21   ;;  %s586_s23 = sadd.s32 4294967294, %s826_s21   ;;  %s826_s21 = sphi %s871_s21, %s16_s21   ;;  %s822_s20 = sphi %s869_s20, %s1045_s20   ;;  %s818_s19 = sphi %s867_s19, %s1044_s19   ;;  %s814_s18 = sphi %s865_s18, %s1043_s18   ;;  %s810_s17 = sphi %s863_s17, %s1042_s17   ;;  %s806_s16 = sphi %s861_s16, %s1041_s16   ;;  %s802_s15 = sphi %s859_s15, %s1040_s15   ;;  %s798_s14 = sphi %s857_s14, %s1039_s14   ;;  %s794_s13 = sphi %s855_s13, %s1038_s13   ;;  %s790_s12 = sphi %s853_s12, %s1037_s12  }
   0x9   : > { %s28_s24 = sadd.s32 1, %s818_s19  ;;  %s35_s25 = sadd.s32 1, %s822_s20 }
   0xa   : > { %p29_p0 = scmp.ge.s32.totalorder %s28_s24, 2  ;;  %s44_s26 = sadd.s32 1, %s806_s16 }
   0xb   : > { %p51_p1 = scmp.ne.s32.totalorder %s806_s16, %s802_s15  ;;  %p52_p2 = scmp.eq.s32.totalorder %s826_s21, 0 }
   0xc   : > { %s1047_s24 = smov (%p29_p0, %s28_s24), 0  ;;  %s1049_s25 = smov (!%p29_p0, %s35_s25), %s822_s20 }
   0xd   : > { %s40_s27 = ssub.s32 %s818_s19, %s1047_s24  ;;  %p916_p3 = por %p52_p2, %p51_p1 }
   0xe   : > { %p37_p4 = scmp.ge.s32.totalorder %s1049_s25, 2  ;;  %s124_s29 = sadd.s32 1, %s798_s14 }
   0xf   : > { %p134_p5 = scmp.ne.s32.totalorder %s798_s14, %s794_s13  ;;  %p135_p6 = scmp.eq.s32.totalorder %s585_s22, 3 }
  0x10   : > { %s1051_s25 = smov (%p37_p4, %s1049_s25), 0  ;;  %p140_p8 = scmp.ne.s32.totalorder %s794_s13, %s790_s12 }
  0x11   : > { %p925_p7 = por %p135_p6, %p134_p5  ;;  %s39_s4 = ssub.s32 %s822_s20, %s1051_s25 }
  0x12   : > { %p141_p9 = scmp.eq.s32.totalorder %s586_s23, 3  ;;  %s41_s5 = sor.u32 %s40_s27, %s39_s4 }
  0x13   : > { %p122_p10 = scmp.eq.s32.totalorder %s39_s4, 0  ;;  %p42_p11 = scmp.eq.s32.totalorder %s41_s5, 0 }
  0x14   : > { %p933_p12 = por %p141_p9, %p140_p8  ;;  %p590_p13 = scmp.ge.s32.totalorder %s826_s21, 4 }
  0x15   : > { %s938_s7 = scalar_select %p122_p10, %s798_s14, %s124_s29  }
  0x16   : > { %s941_s8 = scalar_select %p42_p11, %s806_s16, %s44_s26  }
  0x17   : > { %175 = sbr.rel (%p590_p13) target bundleno = 40 (0x28), region = 24 }
  0x1c   : > { %178 = sbr.rel (!%p916_p3) target bundleno = 40 (0x28), region = 28  ;;  %s180_s9 = sand.u32 (%p916_p3), 1, %s806_s16  }
  0x1d   : > { %s616_s10 = smul.u32 (%p916_p3), 6, %s822_s20  ;;  %s1036_s0 = sld [smem:[#allocation7_spill]] (%p916_p3) }
  0x1e   : > { %s615_s11 = smul.u32 (%p916_p3), 12, %s180_s9 }
  0x1f   : > { %s184_s22 = sadd.s32 (%p916_p3), %s818_s19, %s616_s10 }
  0x20   : > { %s591_s23 = sshll.u32 (%p916_p3), %s184_s22, 2  ;;  %s182_s26 = scalar_lea.vmem (%p916_p3), [#allocation3], %s615_s11 }
  0x23   : > { %s186_s29 = scalar_lea.vmem %s1036_s0, %s591_s23 }
  0x24   : > { %v203_v0 = vld [vmem:[%s186_s29] sm:$0xf]  ;;  %v205_v1 = vld [vmem:[%s186_s29 + $0x8] sm:$0xf]  ;;  %v207_v2 = vld [vmem:[%s186_s29 + $0x10] sm:$0xf] }
  0x25   : > { %204 = vst [vmem:[%s182_s26] sm:$0xf] %v203_v0 }
  0x26   : > { %206 = vst [vmem:[%s182_s26 + $0x4] sm:$0xf] %v205_v1 }
  0x27   : > { %208 = vst [vmem:[%s182_s26 + $0x8] sm:$0xf] %v207_v2 }
  0x28 PF: > { %p592_p0 = scmp.ge.s32.totalorder %s826_s21, 1  ;;  %p237_p1 = scmp.lt.s32.totalorder %s826_s21, 5 }
  0x2a   : > { %p238_p2 = pnand %p592_p0, %p237_p1 }
  0x2b   : > { %s244_s28 = sand.u32 (!%p238_p2), 1, %s802_s15   ;;  %s274_s5 = sand.u32 (!%p238_p2), 1, %s794_s13  }
  0x2c   : > { %241 = sbr.rel (%p238_p2) target bundleno = 619 (0x26b), region = 69  ;;  %s593_s10 = sshll.u32 (!%p238_p2), %s274_s5, 4 }
  0x2d   : > { %s617_s9 = smul.u32 (!%p238_p2), 12, %s244_s28  ;;  %s958_s22 = scalar_lea.vmem (!%p238_p2), [#allocation4], %s593_s10 }
  0x2e   : > { %p594_p3 = scmp.ne.s32.totalorder (!%p238_p2), %s810_s17, 0 }
  0x2f   : > { %s246_s11 = scalar_lea.vmem (!%p238_p2), [#allocation3], %s617_s9 }
  0x31   : > { %294 = sbr.rel (%p594_p3) target bundleno = 57 (0x39), region = 77 }
  0x36   : > { %vm295_vm0 = vcmask 7168   ;;  %v828_v3 = vmov 0.0  }
  0x37   : > { %296 = vst.msk [vmem:[#allocation2] sm:$0xff] %vm295_vm0, %v828_v3 }
  0x38   : > { %297 = vst.msk [vmem:[#allocation2 + $0x8] sm:$0xff] %vm295_vm0, %v828_v3 }
  0x39 PF: > { %v302_v4 = vld [vmem:[%s246_s11 + $0x8] sm:$0x3]  ;;  %vm333_vm1 = vcmask 1041408   ;;  %v829_v7 = vmov 0   ;;  %v613_v10 = vld [vmem:[%s246_s11] sm:$0xff]  ;;  %v304_v11 = vld [vmem:[%s1030_s2 + $0x8] sm:$0xff] }
  0x3a   : > { %v325_v5 = vunpack.c.l.b16 %v302_v4  ;;  %v303_v6 = vld [vmem:[%s1030_s2] sm:$0xff]  ;;  %710 = vset.pattern.permute.xlu0 %v829_v7  ;;  %vm329_vm2 = vcmask 162816   ;;  %s604_s28 = sshll.u32 %s810_s17, 7  ;;  %vm366_vm5 = vcmask 7168   ;;  %p606_p4 = scmp.ne.s32.totalorder %s810_s17, 1 }
  0x3b   : > { %307 = vperm.xlu0 %710, %v303_v6   ;;  %v612_v12 = vld [vmem:[%s1029_s1] sm:$0xff]  ;;  %s371_s9 = sshra.s32 %s604_s28, 7 }
  0x3c   : > { %v327_v8 = vpack.c.b16 %v325_v5, %v325_v5  ;;  %s605_s10 = sshll.u32 %s371_s9, 2 }
  0x3d   : > { %s374_s11 = scalar_lea.vmem %s958_s22, %s605_s10 [#allocation4] }
  0x3e   : > { %v335_v9 = vsel %vm333_vm1, %v327_v8, 0  ;;  %v358_v25 = vld [vmem:[#allocation2] sm:$0xff] }
  0x3f   : > { %343 = vmatpush.bf16.msra.mxu0 %v335_v9  ;;  %v359_v28 = vld [vmem:[#allocation2 + $0x8] sm:$0xff] }
  0x43   : > { %344 = vmatpush.bf16.msra.mxu0 %v613_v10  ;;  %312 = vperm.xlu0 %710, %v304_v11  }
  0x46   : > { %603 = vmatmul.msk.bf16.vlgmr.msra.gmra.mxu0 %vm329_vm2, %v612_v12 }
  0xad   : > { %v308_v13 = vpop.permute.xlu0 %307 }
  0xb5   : > { %v313_v19 = vpop.permute.xlu0 %312 }
  0xc3   : > { %v346_v14 = vpop.f32.mrf.mxu0 }
  0xc4   : > { %v347_v15 = vadd.f32 %v346_v14, %v308_v13 }
  0xc6   : > { %vm351_vm3 = vcmp.ge.f32.partialorder %v347_v15, 0.0  ;;  %v353_v16 = vmul.f32 0.0, %v347_v15 }
  0xc8   : > { %v355_v17 = vsel %vm351_vm3, %v347_v15, %v353_v16 }
  0xc9   : > { %360 = vadd.xlane.f32.xlu1 %v355_v17  ;;  %v369_v18 = vpack.c.bf16 %v355_v17, %v355_v17 }
  0xcb   : > { %375 = vst [vmem:[%s374_s11] sm:$0xf] %v369_v18  ;;  %v348_v20 = vpop.f32.mrf.mxu0 }
  0xcc   : > { %v349_v21 = vadd.f32 %v348_v20, %v313_v19 }
  0xce   : > { %vm352_vm4 = vcmp.ge.f32.partialorder %v349_v21, 0.0  ;;  %v354_v22 = vmul.f32 0.0, %v349_v21 }
  0xd0   : > { %v356_v23 = vsel %vm352_vm4, %v349_v21, %v354_v22 }
  0xd1   : > { %v370_v24 = vpack.c.bf16 %v356_v23, %v356_v23  ;;  %362 = vadd.xlane.f32.xlu1 %v356_v23 }
  0xd3   : > { %376 = vst [vmem:[%s374_s11 + $0x8] sm:$0xf] %v370_v24 }
 0x13c   : > { %v361_v26 = vpop.xlane.xlu1 %360 }
 0x13d   : > { %v364_v27 = vadd.f32 %v361_v26, %v358_v25 }
 0x13f   : > { %367 = vst.msk [vmem:[#allocation2] sm:$0xff] %vm366_vm5, %v364_v27 }
 0x143   : > { %380 = sbr.rel (%p606_p4) target bundleno = 603 (0x25b), region = 81 }
 0x144   : > { %v363_v29 = vpop.xlane.xlu1 %362 }
 0x145   : > { %v365_v30 = vadd.f32 %v363_v29, %v359_v28 }
 0x147   : > { %368 = vst.msk [vmem:[#allocation2 + $0x8] sm:$0xff] %vm366_vm5, %v365_v30 }
 0x148   : > { %v381_v31 = vld [vmem:[#allocation2] sm:$0xff]  ;;  %v830_v32 = vmov 0   ;;  %v385_v36 = vld [vmem:[%s958_s22] sm:$0xff] }
 0x149   : > { %711 = vset.pattern.permute.xlu0 %v830_v32  ;;  %v383_v33 = vmul.f32 0.00390625, %v381_v31  ;;  %v387_v37 = vunpack.c.l.bf16 %v385_v36  ;;  %v388_v38 = vunpack.c.h.bf16 %v385_v36  ;;  %v386_v42 = vld [vmem:[%s958_s22 + $0x8] sm:$0xff] }
 0x14a   : > { %v389_v46 = vunpack.c.l.bf16 %v386_v42  ;;  %v390_v47 = vunpack.c.h.bf16 %v386_v42 }
 0x14b   : > { %393 = vperm.xlu0 %711, %v383_v33  }
 0x14e   : > { %v382_v34 = vld [vmem:[#allocation2 + $0x8] sm:$0xff] }
 0x14f   : > { %v384_v35 = vmul.f32 0.00390625, %v382_v34 }
 0x153   : > { %398 = vperm.xlu0 %711, %v384_v35  }
 0x1bd   : > { %v394_v39 = vpop.permute.xlu0 %393 }
 0x1be   : > { %v401_v40 = vsub.f32 %v387_v37, %v394_v39  ;;  %v402_v41 = vsub.f32 %v388_v38, %v394_v39 }
 0x1c0   : > { %v405_v43 = vmul.f32 %v401_v40, %v401_v40  ;;  %v406_v44 = vmul.f32 %v402_v41, %v402_v41 }
 0x1c2   : > { %v409_v45 = vadd.f32 %v406_v44, %v405_v43 }
 0x1c4   : > { %410 = vadd.xlane.f32.xlu1 %v409_v45 }
 0x1c5   : > { %v399_v48 = vpop.permute.xlu0 %398 }
 0x1c6   : > { %v403_v49 = vsub.f32 %v389_v46, %v399_v48  ;;  %v404_v50 = vsub.f32 %v390_v47, %v399_v48 }
 0x1c8   : > { %v407_v51 = vmul.f32 %v403_v49, %v403_v49  ;;  %v408_v52 = vmul.f32 %v404_v50, %v404_v50 }
 0x1ca   : > { %v412_v53 = vadd.f32 %v408_v52, %v407_v51 }
 0x1cc   : > { %413 = vadd.xlane.f32.xlu1 %v412_v53 }
 0x237   : > { %v411_v54 = vpop.xlane.xlu1 %410 }
 0x238   : > { %v415_v55 = vmul.f32 0.00390625, %v411_v54 }
 0x23a   : > { %v417_v56 = vadd.f32 1e-05, %v415_v55 }
 0x23c   : > { %712 = vrsqrt.f32 %v417_v56  ;;  %vm425_vm7 = vweird.f32 %v417_v56 }
 0x23f   : > { %v414_v57 = vpop.xlane.xlu1 %413 }
 0x240   : > { %v416_v58 = vmul.f32 0.00390625, %v414_v57 }
 0x242   : > { %v713_v59 = vpop.eup %712  ;;  %v418_v60 = vadd.f32 1e-05, %v416_v58 }
 0x243   : > { %v420_v61 = vmul.f32 %v713_v59, %v417_v56  ;;  %vm426_vm6 = vweird.f32 %v713_v59 }
 0x244   : > { %714 = vrsqrt.f32 %v418_v60  ;;  %vm427_vm8 = vmor %vm425_vm7, %vm426_vm6  ;;  %vm435_vm10 = vweird.f32 %v418_v60 }
 0x245   : > { %v421_v62 = vmul.f32 %v713_v59, %v420_v61 }
 0x247   : > { %v422_v63 = vmul.f32 0.5, %v421_v62 }
 0x249   : > { %v423_v0 = vsub.f32 1.5, %v422_v63 }
 0x24a   : > { %v715_v1 = vpop.eup %714 }
 0x24b   : > { %v424_v2 = vmul.f32 %v713_v59, %v423_v0  ;;  %v430_v3 = vmul.f32 %v715_v1, %v418_v60  ;;  %vm436_vm9 = vweird.f32 %v715_v1 }
 0x24c   : > { %vm437_vm11 = vmor %vm435_vm10, %vm436_vm9 }
 0x24d   : > { %v428_v4 = vsel %vm427_vm8, %v713_v59, %v424_v2  ;;  %v431_v5 = vmul.f32 %v715_v1, %v430_v3 }
 0x24e   : > { %v439_v6 = vmul.f32 %v428_v4, %v401_v40  ;;  %v440_v7 = vmul.f32 %v428_v4, %v402_v41 }
 0x24f   : > { %v432_v8 = vmul.f32 0.5, %v431_v5 }
 0x250   : > { %v443_v9 = vpack.c.bf16 %v440_v7, %v439_v6 }
 0x251   : > { %v433_v10 = vsub.f32 1.5, %v432_v8 }
 0x252   : > { %445 = vst [vmem:[%s958_s22] sm:$0xff] %v443_v9 }
 0x253   : > { %v434_v11 = vmul.f32 %v715_v1, %v433_v10 }
 0x255   : > { %v438_v12 = vsel %vm437_vm11, %v715_v1, %v434_v11 }
 0x256   : > { %v441_v13 = vmul.f32 %v438_v12, %v403_v49  ;;  %v442_v14 = vmul.f32 %v438_v12, %v404_v50 }
 0x258   : > { %v444_v15 = vpack.c.bf16 %v442_v14, %v441_v13 }
 0x25a   : > { %446 = vst [vmem:[%s958_s22 + $0x8] sm:$0xff] %v444_v15 }
 0x25b PF: > { %s614_s17 = sshll.u32 %s814_s18, 4  ;;  %s463_s4 = sshll.u32 %s958_s22, 4  ;;  %s464_s4 = int_to_ptr.vmem [resolvable:$true] %s463_s4 }
 0x25c   : > { %s462_s15 = scalar_lea.hbm %s1031_s3, %s614_s17  ;;  %s448_s26 = scalar_lea.sflag [#allocation5], %s274_s5 }
 0x25d   : > { %s465_s29 = sshll.u32 %s462_s15, 4  ;;  %s736_s18 = scalar_lea.hbm %s1031_s3, 32  ;;  %s466_s29 = int_to_ptr.hbm [resolvable:$true] %s465_s29 }
 0x25e   : > { %s730_s28 = sshra.s32 %s466_s29, 4  ;;  %s731_s28 = int_to_ptr.hbm [resolvable:$true] %s730_s28 }
 0x25f   : > { %s732_s9 = scalar_lea.hbm %s731_s28, 16  ;;  %p737_p9 = scmp.lt.s32.totalorder %s731_s28, %s1031_s3 }
 0x260   : > { %p733_p5 = scmp.ne.s32.totalorder %s731_s28, %s732_s9  ;;  %p738_p10 = scmp.lt.s32.totalorder %s736_s18, %s732_s9 }
 0x262   : > { %p734_p6 = pnand %p733_p5, %p925_p7  ;;  %p739_p11 = por %p738_p10, %p737_p9 }
 0x264   : > { %p735_p8 = pneg %p734_p6 }
 0x266   : > { %p740_p13 = pnand %p739_p11, %p735_p8 }
 0x268   : > { %743 = shalt.err (!%p740_p13)
}
 0x269   : > { %s831_s5 = smov 128   ;;  %s832_s22 = smov 8  }
 0x26a   : > { %618 = dma.vmem_to_hbm [thread:$0]  (%p925_p7), %s464_s4, 256, %s466_s29, %s448_s26, %s831_s5, %s831_s5, %s832_s22  }
 0x26b PF: > { %p624_p0 = scmp.ge.s32.totalorder %s826_s21, 2  ;;  %s480_s17 = sand.u32 1, %s790_s12  }
 0x26c   : > { %s481_s0 = scalar_lea.sflag [#allocation5], %s480_s17 }
 0x26d   : > { %p621_p1 = pnand %p624_p0, %p933_p12 }
 0x26f   : > { %p622_p2 = pneg %p621_p1 }
 0x271   : > { %785 = dma.done.wait (%p622_p2), %s481_s0, 256  }
 0x272   : > { %787 = vsyncadd (%p622_p2), %s481_s0, 4294967040  ;;  %s16_s21 = sadd.s32 1, %s826_s21   ;;  %s1037_s12 = smov %s794_s13 }
 0x273   : > { %p13_p3 = scmp.ge.s32.totalorder %s16_s21, 6   ;;  %s1038_s13 = smov %s798_s14 }
 0x274   : > { %s1039_s14 = smov %s938_s7  ;;  %s1040_s15 = smov %s806_s16 }
 0x275   : > { %s1041_s16 = smov %s941_s8  ;;  %s1042_s17 = smov %s818_s19 }
 0x276   : > { %s1043_s18 = smov %s822_s20  ;;  %s1044_s19 = smov %s1047_s24 }
 0x277   : > { %s1045_s20 = smov %s1051_s25  ;;  %15 = sbr.rel (!%p13_p3) target bundleno = 8 (0x8), region = 128 }
 0x27c   :  { %487 = vsyncpa [#allocation5], 1 }
 0x27d   :  { %489 = vsyncpa [#allocation5 + $0x1], 1 }

</bundles_post_ra>
